<compile_context>
chip_gen: v5e
topology: v5e:2x2
jax: 0.10.0
libtpu: 0.0.40
codegen_flags: <defaults>
</compile_context>

<pallas_src>
import functools

import jax
import jax.numpy as jnp
from jax.experimental import pallas as pl
from jax.experimental.pallas import tpu as pltpu

BN_EPS = 1e-5
LANE = 128            # padded feature width for all layers
AUX_ROWS = 3          # row 0 = bias, row 1 = scale (folded BN), row 2 = shift


def _round_up(v, m):
    return (v + m - 1) // m * m


def sage_layer_kernel(a_ref, h_ref, wcat_ref, aux_ref, out_ref, *, apply_relu):
    """One SAGEConv(mean) layer on a row tile of the graph.

    a_ref   : (tm, Np)  bf16   row-normalized in-neighbor adjacency (row tile)
    h_ref   : (Np, F)   bf16   full node features (resident)
    wcat_ref: (2F, F)   bf16   [W_self; W_neigh]
    aux_ref : (3, F)    f32    bias / folded-BN scale / folded-BN shift
    out_ref : (tm, F)          output row tile
    """
    tm = out_ref.shape[0]
    row0 = pl.multiple_of(pl.program_id(0) * tm, tm)

    a_tile = a_ref[...]                              # (tm, Np) bf16
    h_full = h_ref[...]                              # (Np, F)  bf16
    h_self = h_ref[pl.ds(row0, tm), :]               # (tm, F)  bf16

    # Mean aggregation over in-neighbors (FLOP-dominant matmul), f32 accumulate.
    h_neigh = jnp.dot(a_tile, h_full, preferred_element_type=jnp.float32)

    # Fused self+neighbor projection: one MXU call with doubled contraction K.
    h_cat = jnp.concatenate([h_self, h_neigh.astype(jnp.bfloat16)], axis=-1)
    out = jnp.dot(h_cat, wcat_ref[...], preferred_element_type=jnp.float32)

    out = out + aux_ref[0:1, :]                      # bias
    if apply_relu:
        out = jnp.maximum(out, 0.0)
    # TODO(synk): dropout is inference-mode identity (no RNG masking in kernel)
    out = out * aux_ref[1:2, :] + aux_ref[2:3, :]    # folded BN (identity for layers 2/3)

    out_ref[...] = out.astype(out_ref.dtype)


def _layer_call(a, h, wcat, aux, *, apply_relu, out_dtype, tm):
    Np, F = h.shape
    grid = (Np // tm,)
    kernel = functools.partial(sage_layer_kernel, apply_relu=apply_relu)
    return pl.pallas_call(
        kernel,
        out_shape=jax.ShapeDtypeStruct((Np, F), out_dtype),
        grid=grid,
        in_specs=[
            pl.BlockSpec((tm, Np), lambda i: (i, 0)),          # A row tile
            pl.BlockSpec((Np, F), lambda i: (0, 0)),           # full h (resident)
            pl.BlockSpec((2 * F, F), lambda i: (0, 0)),        # fused weights
            pl.BlockSpec((AUX_ROWS, F), lambda i: (0, 0)),     # bias/scale/shift
        ],
        out_specs=pl.BlockSpec((tm, F), lambda i: (i, 0)),
        compiler_params=pltpu.CompilerParams(
            dimension_semantics=("parallel",)),
    )(a, h, wcat, aux)


def graphsage_forward(adj_norm, x, params, *, tm=256):
    f32, bf16 = jnp.float32, jnp.bfloat16
    N, in_feats = x.shape
    h_feats = params["ws1"].shape[1]
    num_classes = params["ws3"].shape[1]
    F = LANE
    assert max(in_feats, h_feats, num_classes) <= F

    # Row-tile size: largest power-of-two <= tm that divides the padded node count.
    Np = _round_up(N, 128)
    tm = min(tm, Np)
    while Np % tm != 0:
        tm //= 2

    # ---- pad + cast inputs (zero-padding is exact for mean-aggregation SAGE) ----
    a_p = jnp.zeros((Np, Np), bf16).at[:N, :N].set(adj_norm.astype(bf16))
    h0 = jnp.zeros((Np, F), bf16).at[:N, :in_feats].set(x.astype(bf16))

    def make_wcat(ws, wn):
        w = jnp.zeros((2 * F, F), f32)
        w = w.at[:ws.shape[0], :ws.shape[1]].set(ws)
        w = w.at[F:F + wn.shape[0], :wn.shape[1]].set(wn)
        return w.astype(bf16)

    def make_aux(bias, scale=None, shift=None):
        width = bias.shape[-1]
        a = jnp.zeros((AUX_ROWS, F), f32)
        a = a.at[0, :width].set(bias.reshape(-1))
        a = a.at[1, :width].set(jnp.ones((width,), f32) if scale is None
                                else scale.reshape(-1))
        if shift is not None:
            a = a.at[2, :width].set(shift.reshape(-1))
        return a

    # Fold BatchNorm(eval) into scale/shift.
    bn_scale = params["gamma"] * jax.lax.rsqrt(params["rvar"] + BN_EPS)
    bn_shift = params["beta"] - params["rmean"] * bn_scale

    w1, aux1 = make_wcat(params["ws1"], params["wn1"]), make_aux(params["b1"], bn_scale, bn_shift)
    w2, aux2 = make_wcat(params["ws2"], params["wn2"]), make_aux(params["b2"])
    w3, aux3 = make_wcat(params["ws3"], params["wn3"]), make_aux(params["b3"])

    h1 = _layer_call(a_p, h0, w1, aux1, apply_relu=True, out_dtype=bf16, tm=tm)
    h2 = _layer_call(a_p, h1, w2, aux2, apply_relu=True, out_dtype=bf16, tm=tm)
    h3 = _layer_call(a_p, h2, w3, aux3, apply_relu=False, out_dtype=f32, tm=tm)

    return h3[:N, :num_classes]


def reference_forward(adj_norm, x, p):
    def layer(a, h, ws, wn, b):
        return h @ ws + (a @ h) @ wn + b
    h = jax.nn.relu(layer(adj_norm, x, p["ws1"], p["wn1"], p["b1"]))
    h = (h - p["rmean"]) * jax.lax.rsqrt(p["rvar"] + BN_EPS) * p["gamma"] + p["beta"]
    h = jax.nn.relu(layer(adj_norm, h, p["ws2"], p["wn2"], p["b2"]))
    return layer(adj_norm, h, p["ws3"], p["wn3"], p["b3"])


def make_params(key, in_feats, h_feats, num_classes):
    ks = jax.random.split(key, 12)
    scale = 0.1
    return {
        "ws1": scale * jax.random.normal(ks[0], (in_feats, h_feats), jnp.float32),
        "wn1": scale * jax.random.normal(ks[1], (in_feats, h_feats), jnp.float32),
        "b1":  scale * jax.random.normal(ks[2], (1, h_feats), jnp.float32),
        "gamma": 1.0 + 0.05 * jax.random.normal(ks[3], (1, h_feats), jnp.float32),
        "beta":  0.05 * jax.random.normal(ks[4], (1, h_feats), jnp.float32),
        "rmean": 0.05 * jax.random.normal(ks[5], (1, h_feats), jnp.float32),
        "rvar":  1.0 + 0.1 * jax.random.uniform(ks[6], (1, h_feats), jnp.float32),
        "ws2": scale * jax.random.normal(ks[7], (h_feats, h_feats), jnp.float32),
        "wn2": scale * jax.random.normal(ks[8], (h_feats, h_feats), jnp.float32),
        "b2":  scale * jax.random.normal(ks[9], (1, h_feats), jnp.float32),
        "ws3": scale * jax.random.normal(ks[10], (h_feats, num_classes), jnp.float32),
        "wn3": scale * jax.random.normal(ks[11], (h_feats, num_classes), jnp.float32),
        "b3":  jnp.zeros((1, num_classes), jnp.float32),
    }


if __name__ == "__main__":
    key = jax.random.PRNGKey(0)
    k_graph, k_x, k_params = jax.random.split(key, 3)

    N = 128            # nodes
    in_feats = 16
    h_feats = 32
    num_classes = 8

    # Random directed graph -> row-normalized in-neighbor adjacency (mean agg).
    adj = jax.random.bernoulli(k_graph, p=0.1, shape=(N, N)).astype(jnp.float32)
    adj = adj * (1.0 - jnp.eye(N, dtype=jnp.float32))          # no self loops
    deg = jnp.maximum(adj.sum(axis=1, keepdims=True), 1.0)
    adj_norm = adj / deg

    x = jax.random.normal(k_x, (N, in_feats), jnp.float32)
    params = make_params(k_params, in_feats, h_feats, num_classes)

    # tm=64 -> grid of 2 row tiles on this small example (exercises the row grid).
    out = graphsage_forward(adj_norm, x, params, tm=64)
    out = jax.block_until_ready(out)

    ref = reference_forward(adj_norm, x, params)
    assert out.shape == (N, num_classes)
    # bf16 MXU inputs with f32 accumulation -> slightly looser tolerance than pure f32.
    assert jnp.allclose(out, ref, atol=3e-2, rtol=3e-2), "mismatch vs JAX reference"

    print("KERNEL_OK")
</pallas_src>

<mosaic_0001>
module attributes {stable_mosaic.version = 11 : i64} {
  func.func @sage_layer_kernel(%arg0: i32, %arg1: memref<64x128xbf16, #tpu.memory_space<vmem>>, %arg2: memref<128x128xbf16, #tpu.memory_space<vmem>>, %arg3: memref<256x128xbf16, #tpu.memory_space<vmem>>, %arg4: memref<3x128xf32, #tpu.memory_space<vmem>>, %arg5: memref<64x128xbf16, #tpu.memory_space<vmem>>) attributes {dimension_semantics = [#tpu.dimension_semantics<parallel>], iteration_bounds = array<i64: 2>, scalar_prefetch = 0 : i64, scratch_operands = 0 : i64, tpu.core_type = #tpu.core_type<tc>, window_params = [{transform_indices = @transform_0, window_bounds = array<i64: 64, 128>}, {pipeline_mode = #tpu.pipeline_mode<synchronous>, transform_indices = @transform_1, window_bounds = array<i64: 128, 128>}, {pipeline_mode = #tpu.pipeline_mode<synchronous>, transform_indices = @transform_2, window_bounds = array<i64: 256, 128>}, {pipeline_mode = #tpu.pipeline_mode<synchronous>, transform_indices = @transform_3, window_bounds = array<i64: 3, 128>}, {transform_indices = @transform_4, window_bounds = array<i64: 64, 128>}]} {
    %c64_i32 = arith.constant 64 : i32
    %0 = arith.muli %arg0, %c64_i32 : i32
    %1 = tpu.assume_multiple %0, 64 : i32
    %c0 = arith.constant 0 : index
    %c0_0 = arith.constant 0 : index
    %2 = vector.load %arg1[%c0, %c0_0] : memref<64x128xbf16, #tpu.memory_space<vmem>>, vector<64x128xbf16>
    %c0_1 = arith.constant 0 : index
    %c0_2 = arith.constant 0 : index
    %3 = vector.load %arg2[%c0_1, %c0_2] : memref<128x128xbf16, #tpu.memory_space<vmem>>, vector<128x128xbf16>
    %4 = arith.index_cast %1 : i32 to index
    %c0_3 = arith.constant 0 : index
    %5 = vector.load %arg2[%4, %c0_3] : memref<128x128xbf16, #tpu.memory_space<vmem>>, vector<64x128xbf16>
    %cst = arith.constant dense<0.000000e+00> : vector<64x128xf32>
    %6 = tpu.matmul %2, %3, %cst {dimension_numbers = #tpu.dot_dimension_numbers<[1], [0], [0], [1], [0, 0, 1, 1], [], []>} : vector<64x128xbf16>, vector<128x128xbf16>, vector<64x128xf32> -> vector<64x128xf32>
    %7 = arith.truncf %6 : vector<64x128xf32> to vector<64x128xbf16>
    %8 = tpu.concatenate %5, %7 in 1 : vector<64x128xbf16>, vector<64x128xbf16> -> vector<64x256xbf16>
    %c0_4 = arith.constant 0 : index
    %c0_5 = arith.constant 0 : index
    %9 = vector.load %arg3[%c0_4, %c0_5] : memref<256x128xbf16, #tpu.memory_space<vmem>>, vector<256x128xbf16>
    %cst_6 = arith.constant dense<0.000000e+00> : vector<64x128xf32>
    %10 = tpu.matmul %8, %9, %cst_6 {dimension_numbers = #tpu.dot_dimension_numbers<[1], [0], [0], [1], [0, 0, 1, 1], [], []>} : vector<64x256xbf16>, vector<256x128xbf16>, vector<64x128xf32> -> vector<64x128xf32>
    %c0_7 = arith.constant 0 : index
    %c0_8 = arith.constant 0 : index
    %11 = vector.load %arg4[%c0_7, %c0_8] : memref<3x128xf32, #tpu.memory_space<vmem>>, vector<1x128xf32>
    %12 = vector.broadcast %11 : vector<1x128xf32> to vector<64x128xf32>
    %13 = arith.addf %10, %12 : vector<64x128xf32>
    %cst_9 = arith.constant 0.000000e+00 : f32
    %14 = vector.broadcast %cst_9 : f32 to vector<64x128xf32>
    %15 = arith.maximumf %13, %14 : vector<64x128xf32>
    %c1 = arith.constant 1 : index
    %c0_10 = arith.constant 0 : index
    %16 = vector.load %arg4[%c1, %c0_10] : memref<3x128xf32, #tpu.memory_space<vmem>>, vector<1x128xf32>
    %17 = vector.broadcast %16 : vector<1x128xf32> to vector<64x128xf32>
    %18 = arith.mulf %15, %17 : vector<64x128xf32>
    %c2 = arith.constant 2 : index
    %c0_11 = arith.constant 0 : index
    %19 = vector.load %arg4[%c2, %c0_11] : memref<3x128xf32, #tpu.memory_space<vmem>>, vector<1x128xf32>
    %20 = vector.broadcast %19 : vector<1x128xf32> to vector<64x128xf32>
    %21 = arith.addf %18, %20 : vector<64x128xf32>
    %22 = arith.truncf %21 : vector<64x128xf32> to vector<64x128xbf16>
    %c0_12 = arith.constant 0 : index
    %c0_13 = arith.constant 0 : index
    %23 = vector.load %arg5[%c0_12, %c0_13] : memref<64x128xbf16, #tpu.memory_space<vmem>>, vector<64x128xbf16>
    tpu.vector_store %arg5[%c0_12, %c0_13], %22 {strides = array<i32>} : memref<64x128xbf16, #tpu.memory_space<vmem>>, vector<64x128xbf16>,
    return
  }
  func.func @transform_0(%arg0: i32) -> (i32, i32) {
    %c0_i32 = arith.constant 0 : i32
    %c0_i32_0 = arith.constant 0 : i32
    return %arg0, %c0_i32 : i32, i32
  }
  func.func @transform_1(%arg0: i32) -> (i32, i32) {
    %c0_i32 = arith.constant 0 : i32
    %c0_i32_0 = arith.constant 0 : i32
    %c0_i32_1 = arith.constant 0 : i32
    return %c0_i32, %c0_i32_0 : i32, i32
  }
  func.func @transform_2(%arg0: i32) -> (i32, i32) {
    %c0_i32 = arith.constant 0 : i32
    %c0_i32_0 = arith.constant 0 : i32
    %c0_i32_1 = arith.constant 0 : i32
    return %c0_i32, %c0_i32_0 : i32, i32
  }
  func.func @transform_3(%arg0: i32) -> (i32, i32) {
    %c0_i32 = arith.constant 0 : i32
    %c0_i32_0 = arith.constant 0 : i32
    %c0_i32_1 = arith.constant 0 : i32
    return %c0_i32, %c0_i32_0 : i32, i32
  }
  func.func @transform_4(%arg0: i32) -> (i32, i32) {
    %c0_i32 = arith.constant 0 : i32
    %c0_i32_0 = arith.constant 0 : i32
    return %arg0, %c0_i32 : i32, i32
  }
}

</mosaic_0001>

<bundles_post_ra>
// kernel: tpu_custom_call.1
= control target key start
LH: loop header
LB: loop body
LE: loop exit
PB: predicated region body
PF: predicated region fallthrough
CT: control target
= control target key end

     0   :  { %9 = vsyncpa [#allocation3], 0  ;;  %s1526_s0 = inlined_call_operand.hbm [shape: bf16[128,128], index: 0, kind: input, shape index: {}]   ;;  %s1527_s1 = inlined_call_operand.hbm [shape: bf16[128,128], index: 1, kind: input, shape index: {}]   ;;  %s1528_s2 = inlined_call_operand.hbm [shape: bf16[256,128], index: 2, kind: input, shape index: {}]   ;;  %s1529_s3 = inlined_call_operand.hbm [shape: f32[3,128], index: 3, kind: input, shape index: {}]   ;;  %s1530_s4 = inlined_call_operand.hbm [shape: bf16[128,128], index: 4, kind: output, shape index: {}]  }
   0x1   :  { %11 = vsyncpa [#allocation3 + $0x1], 0 }
   0x2   :  { %12 = vsyncpa [#allocation6], 0 }
   0x3   :  { %13 = vsyncpa [#allocation9], 0 }
   0x4   :  { %14 = vsyncpa [#allocation4], 0 }
   0x5   :  { %16 = vsyncpa [#allocation4 + $0x1], 0  ;;  %s1341_s15 = smov 0   ;;  %s1343_s16 = smov 0  }
   0x6   :  { %s1345_s17 = smov 0   ;;  %s1347_s18 = smov 0  }
   0x7 LB: > { %s1362_s19 = sadd.s32 4294967295, %s1307_s18   ;;  %s814_s20 = sadd.s32 4294967294, %s1307_s18   ;;  %s1307_s18 = sphi %s1347_s18, %s1541_s18   ;;  %s1303_s17 = sphi %s1345_s17, %s1540_s17   ;;  %s1299_s16 = sphi %s1343_s16, %s1539_s16   ;;  %s1295_s15 = sphi %s1341_s15, %s1538_s15  }
   0x8   : > { %p42_p0 = scmp.ne.s32.totalorder %s1299_s16, %s1295_s15  ;;  %p43_p1 = scmp.eq.s32.totalorder %s1362_s19, 0 }
   0x9   : > { %p129_p2 = scmp.eq.s32.totalorder %s1362_s19, 1  ;;  %p135_p3 = scmp.eq.s32.totalorder %s814_s20, 1 }
   0xa   : > { %p1371_p4 = por %p43_p1, %p42_p0  ;;  %p815_p5 = scmp.ge.s32.totalorder %s1307_s18, 1 }
   0xb   : > { %p1376_p6 = por %p135_p3, %p42_p0  ;;  %p142_p7 = scmp.lt.s32.totalorder %s1307_s18, 3 }
   0xc   : > { %s153_s25 = sshll.u32 %s1527_s1, 4  ;;  %s1309_s27 = smov [#allocation5]   ;;  %s154_s25 = int_to_ptr.hbm [resolvable:$true] %s153_s25 }
   0xd   : > { %p1384_p8 = pnand %p815_p5, %p142_p7  ;;  %s155_s28 = sshll.u32 %s1309_s27, 4  ;;  %s156_s28 = int_to_ptr.vmem [resolvable:$true] %s155_s28 }
   0xe   : > { %s167_s6 = sshll.u32 %s1528_s2, 4  ;;  %s1310_s7 = smov 64   ;;  %s168_s6 = int_to_ptr.hbm [resolvable:$true] %s167_s6 }
   0xf   : > { %p1045_p9 = pneg %p1384_p8  ;;  %s1311_s8 = smov 4  }
  0x10   : > { %s1312_s9 = smov [#allocation7]   ;;  %s182_s13 = sshll.u32 %s1529_s3, 4  ;;  %s183_s13 = int_to_ptr.hbm [resolvable:$true] %s182_s13 }
  0x11   : > { %p1392_p10 = pnand %p1045_p9, %p43_p1  ;;  %s169_s10 = sshll.u32 %s1312_s9, 4  ;;  %s170_s10 = int_to_ptr.vmem [resolvable:$true] %s169_s10 }
  0x12   : > { %s1313_s14 = smov [#allocation8]   ;;  %s1414_s23 = sadd.s32 1, %s1307_s18  }
  0x13   : > { %1048 = dma.hbm_to_vmem [thread:$0]  (!%p1392_p10), %s154_s25, 1024, %s156_s28, [#allocation6], %s1310_s7, %s1310_s7, %s1311_s8  }
  0x14   : > { %1051 = dma.hbm_to_vmem [thread:$0]  (!%p1392_p10), %s168_s6, 2048, %s170_s10, [#allocation6], %s1310_s7, %s1310_s7, %s1311_s8  }
  0x15   : > { %s184_s20 = sshll.u32 %s1313_s14, 4  ;;  %s26_s24 = ssub.s32 %s1307_s18, %s1414_s23  ;;  %s185_s20 = int_to_ptr.vmem [resolvable:$true] %s184_s20 }
  0x16   : > { %1054 = dma.hbm_to_vmem [thread:$0]  (!%p1392_p10), %s183_s13, 64, %s185_s20, [#allocation9]  }
  0x17   : > { %s29_s25 = sadd.s32 1, %s1303_s17  ;;  %p27_p12 = scmp.eq.s32.totalorder %s26_s24, 0 }
  0x18   : > { %p36_p13 = scmp.ne.s32.totalorder %s1303_s17, %s1299_s16  ;;  %p37_p0 = scmp.eq.s32.totalorder %s1307_s18, 0 }
  0x19   : > { %s1425_s27 = scalar_select %p27_p12, %s1303_s17, %s29_s25  }
  0x1a   : > { %p1429_p3 = por %p129_p2, %p36_p13  ;;  %p1066_p5 = scmp.lt.s32.totalorder %s1307_s18, 2 }
  0x1b   : > { %s195_s30 = sand.u32 1, %s1303_s17   ;;  %s964_s5 = sshll.u32 %s1307_s18, 5 }
  0x1c   : > { %p38_p7 = por %p37_p0, %p36_p13  ;;  %s820_s6 = sshll.u32 %s195_s30, 5 }
  0x1d   : > { %s204_s10 = scalar_lea.hbm %s1526_s0, %s964_s5  ;;  %s199_s12 = scalar_lea.vmem [#allocation2], %s820_s6 }
  0x1e   : > { %s205_s11 = sshll.u32 %s204_s10, 4  ;;  %s207_s13 = sshll.u32 %s199_s12, 4  ;;  %s206_s11 = int_to_ptr.hbm [resolvable:$true] %s205_s11  ;;  %s208_s13 = int_to_ptr.vmem [resolvable:$true] %s207_s13 }
  0x1f   : > { %p1439_p9 = pnand %p1066_p5, %p38_p7  ;;  %s196_s20 = scalar_lea.sflag [#allocation3], %s195_s30 }
  0x20   : > { %s1203_s24 = sshra.s32 %s206_s11, 4  ;;  %s1210_s6 = scalar_lea.hbm %s1526_s0, 64  ;;  %s1204_s24 = int_to_ptr.hbm [resolvable:$true] %s1203_s24 }
  0x21   : > { %s1205_s25 = scalar_lea.hbm %s1204_s24, 32  ;;  %p1207_p10 = pneg %p1439_p9 }
  0x22   : > { %p1206_p2 = scmp.ne.s32.totalorder %s1204_s24, %s1205_s25  ;;  %p1211_p0 = scmp.lt.s32.totalorder %s1204_s24, %s1526_s0 }
  0x23   : > { %p1212_p5 = scmp.lt.s32.totalorder %s1210_s6, %s1205_s25 }
  0x24   : > { %p1208_p12 = pnand %p1207_p10, %p1206_p2 }
  0x25   : > { %p1213_p7 = por %p1212_p5, %p1211_p0 }
  0x26   : > { %p1209_p13 = pneg %p1208_p12 }
  0x28   : > { %p1214_p11 = pnand %p1213_p7, %p1209_p13 }
  0x2a   : > { %1217 = shalt.err (!%p1214_p11)
}
  0x2b   : > { %1058 = dma.hbm_to_vmem [thread:$0]  (!%p1439_p9), %s206_s11, 512, %s208_s13, %s196_s20, %s1310_s7, %s1310_s7, %s1311_s8  }
  0x2c   : > { %219 = sbr.rel (%p1384_p8) target bundleno = 428 (0x1ac), region = 36  ;;  %s1459_s30 = sand.u32 (!%p1384_p8), 1, %s1299_s16  }
  0x2d   : > { %s824_s12 = sshll.u32 (!%p1384_p8), %s1459_s30, 5  ;;  %s222_s24 = scalar_lea.sflag (!%p1384_p8), [#allocation3], %s1459_s30 }
  0x2e   : > { %s1465_s25 = scalar_lea.vmem (!%p1384_p8), [#allocation2], %s824_s12 }
  0x31   : > { %1278 = dma.done.wait (%p1371_p4), %s222_s24, 512  }
  0x32   : > { %1280 = vsyncadd (%p1371_p4), %s222_s24, 4294966784 }
  0x33   : > { %1282 = dma.done.wait (%p43_p1), [#allocation6], 3072  }
  0x34   : > { %1284 = vsyncadd (%p43_p1), [#allocation6], 4294964224 }
  0x35   : > { %1286 = dma.done.wait (%p43_p1), [#allocation9], 64  }
  0x36   : > { %1288 = vsyncadd (%p43_p1), [#allocation9], 4294967232  ;;  %v976_v0 = vld [vmem:[#allocation5 + $0x38] sm:$0xff]  ;;  %v975_v1 = vld [vmem:[#allocation5 + $0x30] sm:$0xff]  ;;  %s829_s21 = sshll.u32 %s1362_s19, 6  ;;  %s1486_s11 = scalar_lea.vmem [#allocation10], %s824_s12 }
  0x37   : > { %377 = vmatpush.bf16.msra.mxu0 %v976_v0  ;;  %1021 = vmatpush.bf16.msra.mxu3 %v976_v0  ;;  %v974_v2 = vld [vmem:[#allocation5 + $0x28] sm:$0xff]  ;;  %v973_v3 = vld [vmem:[#allocation5 + $0x20] sm:$0xff]  ;;  %v972_v4 = vld [vmem:[#allocation5 + $0x18] sm:$0xff]  ;;  %s293_s26 = sshra.s32 %s829_s21, 3  ;;  %s997_s13 = sshll.u32 %s1362_s19, 5 }
  0x38   : > { %v971_v5 = vld [vmem:[#allocation5 + $0x10] sm:$0xff]  ;;  %v970_v6 = vld [vmem:[#allocation5 + $0x8] sm:$0xff]  ;;  %v969_v7 = vld [vmem:[#allocation5] sm:$0xff]  ;;  %s830_s7 = sshll.u32 %s293_s26, 2  ;;  %s706_s5 = scalar_lea.hbm %s1530_s4, %s997_s13 }
  0x39   : > { %v965_v8 = vld [vmem:[%s1465_s25] sm:$0xff]  ;;  %v966_v9 = vld [vmem:[%s1465_s25 + $0x8] sm:$0xff]  ;;  %v988_v10 = vld [vmem:[#allocation7 + $0x38] sm:$0xff]  ;;  %s296_s8 = scalar_lea.vmem [#allocation5], %s830_s7  ;;  %s707_s29 = sshll.u32 %s1486_s11, 4  ;;  %s708_s29 = int_to_ptr.vmem [resolvable:$true] %s707_s29 }
  0x3a   : > { %v996_v11 = vld [vmem:[#allocation7 + $0x78] sm:$0xff]  ;;  %592 = vmatpush.bf16.msra.mxu1 %v988_v10  ;;  %v987_v12 = vld [vmem:[#allocation7 + $0x30] sm:$0xff]  ;;  %v986_v14 = vld [vmem:[#allocation7 + $0x28] sm:$0xff]  ;;  %s709_s6 = sshll.u32 %s706_s5, 4  ;;  %s695_s9 = scalar_lea.sflag [#allocation4], %s1459_s30  ;;  %s710_s6 = int_to_ptr.hbm [resolvable:$true] %s709_s6 }
  0x3b   : > { %378 = vmatpush.bf16.msra.mxu0 %v975_v1  ;;  %1022 = vmatpush.bf16.msra.mxu3 %v975_v1  ;;  %v995_v13 = vld [vmem:[#allocation7 + $0x70] sm:$0xff]  ;;  %v994_v15 = vld [vmem:[#allocation7 + $0x68] sm:$0xff]  ;;  %v985_v16 = vld [vmem:[#allocation7 + $0x20] sm:$0xff]  ;;  %s1247_s19 = sshra.s32 %s710_s6, 4  ;;  %s1248_s19 = int_to_ptr.hbm [resolvable:$true] %s1247_s19 }
  0x3c   : > { %621 = vmatpush.bf16.msra.mxu2 %v996_v11  ;;  %v993_v17 = vld [vmem:[#allocation7 + $0x60] sm:$0xff]  ;;  %v967_v18 = vld [vmem:[%s1465_s25 + $0x10] sm:$0xff]  ;;  %v984_v19 = vld [vmem:[#allocation7 + $0x18] sm:$0xff]  ;;  %s1249_s10 = scalar_lea.hbm %s1248_s19, 32  ;;  %p1254_p11 = scmp.lt.s32.totalorder %s1248_s19, %s1530_s4 }
  0x3d   : > { %v968_v20 = vld [vmem:[%s1465_s25 + $0x18] sm:$0xff]  ;;  %v983_v21 = vld [vmem:[#allocation7 + $0x10] sm:$0xff]  ;;  %v982_v23 = vld [vmem:[#allocation7 + $0x8] sm:$0xff]  ;;  %p1250_p1 = scmp.ne.s32.totalorder %s1248_s19, %s1249_s10  ;;  %s1253_s25 = scalar_lea.hbm %s1530_s4, 64 }
  0x3e   : > { %593 = vmatpush.bf16.msra.mxu1 %v987_v12  ;;  %v992_v22 = vld [vmem:[#allocation7 + $0x58] sm:$0xff]  ;;  %v991_v24 = vld [vmem:[#allocation7 + $0x50] sm:$0xff]  ;;  %v981_v25 = vld [vmem:[#allocation7] sm:$0xff]  ;;  %p1255_p9 = scmp.lt.s32.totalorder %s1253_s25, %s1249_s10 }
  0x3f   : > { %379 = vmatpush.bf16.msra.mxu0 %v974_v2  ;;  %1023 = vmatpush.bf16.msra.mxu3 %v974_v2  ;;  %v990_v26 = vld [vmem:[#allocation7 + $0x48] sm:$0xff]  ;;  %v977_v27 = vld [vmem:[%s296_s8] sm:$0xff]  ;;  %v979_v35 = vld [vmem:[%s296_s8 + $0x10] sm:$0xff]  ;;  %p1251_p4 = pnand %p1250_p1, %p1429_p3 }
  0x40   : > { %622 = vmatpush.bf16.msra.mxu2 %v995_v13  ;;  %v989_v28 = vld [vmem:[#allocation7 + $0x40] sm:$0xff]  ;;  %v978_v29 = vld [vmem:[%s296_s8 + $0x8] sm:$0xff]  ;;  %v980_v43 = vld [vmem:[%s296_s8 + $0x18] sm:$0xff]  ;;  %p1256_p2 = por %p1255_p9, %p1254_p11 }
  0x41   : > { %v1110_v62 = vld [vmem:[#allocation8] ss:$0 sm:$0xff]  ;;  %p1252_p8 = pneg %p1251_p4 }
  0x42   : > { %594 = vmatpush.bf16.msra.mxu1 %v986_v14 }
  0x43   : > { %380 = vmatpush.bf16.msra.mxu0 %v973_v3  ;;  %1024 = vmatpush.bf16.msra.mxu3 %v973_v3  ;;  %p1257_p10 = pnand %p1256_p2, %p1252_p8 }
  0x44   : > { %623 = vmatpush.bf16.msra.mxu2 %v994_v15 }
  0x46   : > { %595 = vmatpush.bf16.msra.mxu1 %v985_v16 }
  0x47   : > { %381 = vmatpush.bf16.msra.mxu0 %v972_v4  ;;  %1025 = vmatpush.bf16.msra.mxu3 %v972_v4 }
  0x48   : > { %624 = vmatpush.bf16.msra.mxu2 %v993_v17 }
  0x4a   : > { %596 = vmatpush.bf16.msra.mxu1 %v984_v19 }
  0x4b   : > { %382 = vmatpush.bf16.msra.mxu0 %v971_v5  ;;  %1026 = vmatpush.bf16.msra.mxu3 %v971_v5  ;;  %v1111_v5 = vld [vmem:[#allocation8 + $0x1] ss:$0 sm:$0xff] }
  0x4c   : > { %625 = vmatpush.bf16.msra.mxu2 %v992_v22 }
  0x4e   : > { %597 = vmatpush.bf16.msra.mxu1 %v983_v21 }
  0x4f   : > { %383 = vmatpush.bf16.msra.mxu0 %v970_v6  ;;  %1027 = vmatpush.bf16.msra.mxu3 %v970_v6 }
  0x50   : > { %626 = vmatpush.bf16.msra.mxu2 %v991_v24 }
  0x52   : > { %598 = vmatpush.bf16.msra.mxu1 %v982_v23 }
  0x53   : > { %384 = vmatpush.bf16.msra.mxu0 %v969_v7  ;;  %1028 = vmatpush.bf16.msra.mxu3 %v969_v7 }
  0x54   : > { %627 = vmatpush.bf16.msra.mxu2 %v990_v26 }
  0x56   : > { %385 = vmatmul.bf16.vlgmr.msra.gmra.mxu0 %v965_v8  ;;  %390 = vmatmul.bf16.vlgmr.msra.gmra.mxu3 %v966_v9  ;;  %v1112_v9 = vld [vmem:[#allocation8 + $0x2] ss:$0 sm:$0xff] }
  0x57   : > { %599 = vmatpush.bf16.msra.mxu1 %v981_v25 }
  0x58   : > { %628 = vmatpush.bf16.msra.mxu2 %v989_v28 }
  0x5a   : > { %600 = vmatmul.bf16.vlgmr.msra.gmra.mxu1 %v977_v27 }
  0x66   : > { %395 = vmatmul.bf16.gmra.mxu3 %v967_v18 }
  0x6a   : > { %605 = vmatmul.bf16.gmra.mxu1 %v978_v29 }
  0x76   : > { %400 = vmatmul.bf16.gmra.mxu3 %v968_v20 }
  0x7a   : > { %610 = vmatmul.bf16.gmra.mxu1 %v979_v35 }
  0x8a   : > { %615 = vmatmul.bf16.gmra.mxu1 %v980_v43 }
  0xd3   : > { %v386_v30 = vpop.f32.mrf.mxu0 }
  0xd4   : > { %v406_v32 = vpack.c.bf16 %v386_v30, %v386_v30 }
  0xd6   : > { %v446_v36 = vunpack.c.l.b16 %v406_v32 }
  0xd7   : > { %v601_v60 = vpop.f32.mrf.mxu1 }
  0xd8   : > { %v602_v63 = vadd.f32 %v1110_v62, %v601_v60 }
  0xd9   : > { %v391_v31 = vpop.f32.mrf.mxu3 }
  0xda   : > { %v408_v40 = vpack.c.bf16 %v391_v31, %v391_v31 }
  0xdb   : > { %v388_v33 = vpop.f32.mrf.mxu0 }
  0xdc   : > { %v407_v34 = vpack.c.bf16 %v388_v33, %v388_v33  ;;  %v448_v44 = vunpack.c.l.b16 %v408_v40 }
  0xde   : > { %v447_v37 = vunpack.c.l.b16 %v407_v34 }
  0xdf   : > { %v603_v61 = vpop.f32.mrf.mxu1 }
  0xe0   : > { %v454_v38 = vpack.c.b16 %v447_v37, %v446_v36  ;;  %v604_v3 = vadd.f32 %v1110_v62, %v603_v61 }
  0xe1   : > { %v393_v39 = vpop.f32.mrf.mxu3 }
  0xe2   : > { %629 = vmatmul.bf16.vlgmr.msra.gmra.mxu2 %v454_v38  ;;  %v409_v41 = vpack.c.bf16 %v393_v39, %v393_v39 }
  0xe4   : > { %v449_v45 = vunpack.c.l.b16 %v409_v41 }
  0xe6   : > { %v455_v46 = vpack.c.b16 %v449_v45, %v448_v44 }
  0xe7   : > { %v606_v1 = vpop.f32.mrf.mxu1 }
  0xe8   : > { %v607_v14 = vadd.f32 %v1110_v62, %v606_v1 }
  0xe9   : > { %v396_v42 = vpop.f32.mrf.mxu3 }
  0xea   : > { %v410_v48 = vpack.c.bf16 %v396_v42, %v396_v42 }
  0xec   : > { %v450_v51 = vunpack.c.l.b16 %v410_v48 }
  0xef   : > { %v608_v11 = vpop.f32.mrf.mxu1 }
  0xf0   : > { %v609_v20 = vadd.f32 %v1110_v62, %v608_v11 }
  0xf1   : > { %v398_v47 = vpop.f32.mrf.mxu3 }
  0xf2   : > { %634 = vmatmul.bf16.gmra.mxu2 %v455_v46  ;;  %v411_v49 = vpack.c.bf16 %v398_v47, %v398_v47 }
  0xf4   : > { %v451_v52 = vunpack.c.l.b16 %v411_v49 }
  0xf6   : > { %v456_v53 = vpack.c.b16 %v451_v52, %v450_v51 }
  0xf7   : > { %v611_v19 = vpop.f32.mrf.mxu1 }
  0xf8   : > { %v612_v28 = vadd.f32 %v1110_v62, %v611_v19 }
  0xf9   : > { %v401_v50 = vpop.f32.mrf.mxu3 }
  0xfa   : > { %v412_v55 = vpack.c.bf16 %v401_v50, %v401_v50 }
  0xfc   : > { %v452_v57 = vunpack.c.l.b16 %v412_v55 }
  0xff   : > { %v613_v30 = vpop.f32.mrf.mxu1 }
 0x100   : > { %v614_v34 = vadd.f32 %v1110_v62, %v613_v30 }
 0x101   : > { %v403_v54 = vpop.f32.mrf.mxu3 }
 0x102   : > { %639 = vmatmul.bf16.gmra.mxu2 %v456_v53  ;;  %v413_v56 = vpack.c.bf16 %v403_v54, %v403_v54 }
 0x104   : > { %v453_v58 = vunpack.c.l.b16 %v413_v56 }
 0x106   : > { %v457_v59 = vpack.c.b16 %v453_v58, %v452_v57 }
 0x107   : > { %v616_v38 = vpop.f32.mrf.mxu1 }
 0x108   : > { %v617_v43 = vadd.f32 %v1110_v62, %v616_v38 }
 0x10f   : > { %v618_v48 = vpop.f32.mrf.mxu1 }
 0x110   : > { %v619_v49 = vadd.f32 %v1110_v62, %v618_v48 }
 0x112   : > { %644 = vmatmul.bf16.gmra.mxu2 %v457_v59 }
 0x165   : > { %v630_v0 = vpop.f32.mrf.mxu2 }
 0x166   : > { %v631_v2 = vadd.f32 %v630_v0, %v602_v63 }
 0x168   : > { %v650_v4 = vmax.f32 %v631_v2, 0.0 }
 0x16a   : > { %v660_v8 = vmul.f32 %v1111_v5, %v650_v4 }
 0x16c   : > { %v670_v13 = vadd.f32 %v1112_v9, %v660_v8 }
 0x16d   : > { %v632_v6 = vpop.f32.mrf.mxu2 }
 0x16e   : > { %v633_v7 = vadd.f32 %v632_v6, %v604_v3 }
 0x170   : > { %v651_v10 = vmax.f32 %v633_v7, 0.0 }
 0x172   : > { %v661_v12 = vmul.f32 %v1111_v5, %v651_v10 }
 0x174   : > { %v671_v15 = vadd.f32 %v1112_v9, %v661_v12 }
 0x175   : > { %v635_v16 = vpop.f32.mrf.mxu2 }
 0x176   : > { %v1001_v17 = vpack.c.bf16 %v671_v15, %v670_v13  ;;  %v636_v18 = vadd.f32 %v635_v16, %v607_v14 }
 0x178   : > { %1002 = vst [vmem:[%s1486_s11] sm:$0xff] %v1001_v17   ;;  %v652_v21 = vmax.f32 %v636_v18, 0.0 }
 0x17a   : > { %v662_v24 = vmul.f32 %v1111_v5, %v652_v21 }
 0x17c   : > { %v672_v27 = vadd.f32 %v1112_v9, %v662_v24 }
 0x17d   : > { %v637_v22 = vpop.f32.mrf.mxu2 }
 0x17e   : > { %v638_v23 = vadd.f32 %v637_v22, %v609_v20 }
 0x180   : > { %v653_v25 = vmax.f32 %v638_v23, 0.0 }
 0x182   : > { %v663_v26 = vmul.f32 %v1111_v5, %v653_v25 }
 0x184   : > { %v673_v29 = vadd.f32 %v1112_v9, %v663_v26 }
 0x185   : > { %v640_v31 = vpop.f32.mrf.mxu2 }
 0x186   : > { %v1006_v32 = vpack.c.bf16 %v673_v29, %v672_v27  ;;  %v641_v33 = vadd.f32 %v640_v31, %v612_v28 }
 0x188   : > { %1018 = vst [vmem:[%s1486_s11 + $0x8] sm:$0xff] %v1006_v32   ;;  %v654_v35 = vmax.f32 %v641_v33, 0.0 }
 0x18a   : > { %v664_v39 = vmul.f32 %v1111_v5, %v654_v35 }
 0x18c   : > { %v674_v42 = vadd.f32 %v1112_v9, %v664_v39 }
 0x18d   : > { %v642_v36 = vpop.f32.mrf.mxu2 }
 0x18e   : > { %v643_v37 = vadd.f32 %v642_v36, %v614_v34 }
 0x190   : > { %v655_v40 = vmax.f32 %v643_v37, 0.0 }
 0x192   : > { %v665_v41 = vmul.f32 %v1111_v5, %v655_v40 }
 0x194   : > { %v675_v44 = vadd.f32 %v1112_v9, %v665_v41 }
 0x195   : > { %v645_v45 = vpop.f32.mrf.mxu2 }
 0x196   : > { %v1011_v46 = vpack.c.bf16 %v675_v44, %v674_v42  ;;  %v646_v47 = vadd.f32 %v645_v45, %v617_v43 }
 0x198   : > { %1019 = vst [vmem:[%s1486_s11 + $0x10] sm:$0xff] %v1011_v46   ;;  %v656_v50 = vmax.f32 %v646_v47, 0.0 }
 0x19a   : > { %v666_v53 = vmul.f32 %v1111_v5, %v656_v50 }
 0x19c   : > { %v676_v56 = vadd.f32 %v1112_v9, %v666_v53 }
 0x19d   : > { %v647_v51 = vpop.f32.mrf.mxu2 }
 0x19e   : > { %v648_v52 = vadd.f32 %v647_v51, %v619_v49 }
 0x1a0   : > { %v657_v54 = vmax.f32 %v648_v52, 0.0 }
 0x1a2   : > { %v667_v55 = vmul.f32 %v1111_v5, %v657_v54 }
 0x1a4   : > { %v677_v57 = vadd.f32 %v1112_v9, %v667_v55 }
 0x1a6   : > { %v1016_v58 = vpack.c.bf16 %v677_v57, %v676_v56 }
 0x1a8   : > { %1020 = vst [vmem:[%s1486_s11 + $0x18] sm:$0xff] %v1016_v58  }
 0x1a9   : > { %1260 = shalt.err (!%p1257_p10)
}
 0x1aa   : > { %s1314_s30 = smov 64   ;;  %s1315_s7 = smov 4  }
 0x1ab   : > { %1043 = dma.vmem_to_hbm [thread:$0]  (%p1429_p3), %s708_s29, 512, %s710_s6, %s695_s9, %s1314_s30, %s1314_s30, %s1315_s7  }
 0x1ac PF: > { %s724_s8 = sand.u32 1, %s1295_s15   ;;  %p1537_p12 = scmp.ge.s32.totalorder %s1307_s18, 2 }
 0x1ad   : > { %s725_s11 = scalar_lea.sflag [#allocation4], %s724_s8 }
 0x1ae   : > { %p1060_p13 = pnand %p1537_p12, %p1376_p6 }
 0x1b0   : > { %p1061_p0 = pneg %p1060_p13 }
 0x1b2   : > { %1290 = dma.done.wait (%p1061_p0), %s725_s11, 512  }
 0x1b3   : > { %1292 = vsyncadd (%p1061_p0), %s725_s11, 4294966784  ;;  %p19_p5 = scmp.ge.s32.totalorder %s1414_s23, 4   ;;  %s1538_s15 = smov %s1299_s16 }
 0x1b4   : > { %s1539_s16 = smov %s1303_s17  ;;  %s1540_s17 = smov %s1425_s27 }
 0x1b5   : > { %s1541_s18 = smov %s1414_s23  ;;  %21 = sbr.rel (!%p19_p5) target bundleno = 7 (0x7), region = 94 }
 0x1ba   :  { %731 = vsyncpa [#allocation3], 1 }
 0x1bb   :  { %733 = vsyncpa [#allocation3 + $0x1], 1 }
 0x1bc   :  { %734 = vsyncpa [#allocation6], 1 }
 0x1bd   :  { %735 = vsyncpa [#allocation9], 1 }
 0x1be   :  { %736 = vsyncpa [#allocation4], 1 }
 0x1bf   :  { %738 = vsyncpa [#allocation4 + $0x1], 1 }

</bundles_post_ra>
